<compile_context>
chip_gen: v5e
topology: v5e:2x2
jax: 0.10.0
libtpu: 0.0.40
codegen_flags: <defaults>
</compile_context>

<pallas_src>
import functools
import math

import jax
import jax.numpy as jnp
from jax import lax
from jax.experimental import pallas as pl
from jax.experimental.pallas import tpu as pltpu


# ----------------------------------------------------------------------------
# Flags / limits
# ----------------------------------------------------------------------------
GELU_APPROX = False              # exact erf GELU (HF BERT default); True -> tanh (EUP)
VMEM_LIMIT_BYTES = 48 * 1024 * 1024   # < v7x 64 MiB physical; generous on v5e/v6e


# ----------------------------------------------------------------------------
# helpers
# ----------------------------------------------------------------------------
def _pick_tile_and_pad(m, max_tile):
    """Row tile (multiple of 8) + padded row count.

    Never returns a tile smaller than 8 rows (sublane granularity); callers pad
    M up to a multiple of the tile so non-divisible B*S doesn't silently
    collapse into 1-row blocks (per perf review)."""
    if m >= max_tile:
        tm = max_tile
    else:
        tm = max(8, -(-m // 8) * 8)
    mp = -(-m // tm) * tm
    return tm, mp


def _pad_rows(a, mp):
    m = a.shape[0]
    if mp == m:
        return a
    return jnp.pad(a, ((0, mp - m), (0, 0)))


def _dense_max_tile(k, n):
    # 3072-wide FFN operands need ~2x smaller row tile to fit v5e's 16 MiB
    # default scoped VMEM (f32 accumulator + GELU temps included).
    return 256 if max(k, n) >= 2048 else 512


# --- single-buffering of constant-index operands (pl.Buffered(1)) -----------
_single_buffer_ok = None


def _copy_probe_kernel(x_ref, o_ref):
    o_ref[...] = x_ref[...]


def _single_buffer_supported():
    """Probe (construct + lower + run a tiny kernel) whether
    pipeline_mode=pl.Buffered(1) is supported; cache the result."""
    global _single_buffer_ok
    if _single_buffer_ok is None:
        ok = False
        if hasattr(pl, "Buffered"):
            try:
                spec = pl.BlockSpec((8, 128), lambda i: (0, 0),
                                    pipeline_mode=pl.Buffered(1))
                y = pl.pallas_call(
                    _copy_probe_kernel,
                    out_shape=jax.ShapeDtypeStruct((8, 128), jnp.float32),
                    grid=(1,),
                    in_specs=[spec],
                    out_specs=pl.BlockSpec((8, 128), lambda i: (0, 0)),
                )(jnp.ones((8, 128), jnp.float32))
                jax.block_until_ready(y)
                ok = True
            except Exception:
                ok = False
        _single_buffer_ok = ok
    return _single_buffer_ok


def _const_spec(block_shape, index_map):
    """BlockSpec for operands whose block index never changes across the grid
    (weights, biases, LN params): single-buffer them to save VMEM."""
    if _single_buffer_supported():
        return pl.BlockSpec(block_shape, index_map, pipeline_mode=pl.Buffered(1))
    return pl.BlockSpec(block_shape, index_map)


# ----------------------------------------------------------------------------
# Pallas kernels
# ----------------------------------------------------------------------------
def _dense_kernel(x_ref, w_ref, b_ref, o_ref, *, activation):
    # x: (tm, K) bf16, w: (K, N) bf16, b: (1, N) -> o: (tm, N)
    y = jnp.dot(x_ref[...], w_ref[...], preferred_element_type=jnp.float32)
    y = y + b_ref[...].astype(jnp.float32)
    if activation == "gelu":
        y = jax.nn.gelu(y, approximate=GELU_APPROX)
    o_ref[...] = y.astype(o_ref.dtype)


def dense(x, w, b, activation=None, out_dtype=None):
    M, K = x.shape
    N = w.shape[1]
    out_dtype = out_dtype or x.dtype
    tm, Mp = _pick_tile_and_pad(M, _dense_max_tile(K, N))
    x_p = _pad_rows(x, Mp)
    out = pl.pallas_call(
        functools.partial(_dense_kernel, activation=activation),
        out_shape=jax.ShapeDtypeStruct((Mp, N), out_dtype),
        grid=(Mp // tm,),
        in_specs=[
            pl.BlockSpec((tm, K), lambda i: (i, 0)),
            _const_spec((K, N), lambda i: (0, 0)),
            _const_spec((1, N), lambda i: (0, 0)),
        ],
        out_specs=pl.BlockSpec((tm, N), lambda i: (i, 0)),
        compiler_params=pltpu.CompilerParams(
            dimension_semantics=("parallel",),
            vmem_limit_bytes=VMEM_LIMIT_BYTES),
    )(x_p, w, b.reshape(1, N))
    return out if Mp == M else out[:M]


def _dense_add_ln_kernel(x_ref, w_ref, b_ref, r_ref, g_ref, bb_ref, o_ref,
                         *, eps):
    # o = LayerNorm(x @ w + b + residual) ; stats in f32.
    y = jnp.dot(x_ref[...], w_ref[...], preferred_element_type=jnp.float32)
    y = y + b_ref[...].astype(jnp.float32) + r_ref[...].astype(jnp.float32)
    mu = jnp.mean(y, axis=-1, keepdims=True)
    var = jnp.mean(jnp.square(y - mu), axis=-1, keepdims=True)
    o_ref[...] = ((y - mu) * lax.rsqrt(var + eps)
                  * g_ref[...].astype(jnp.float32)
                  + bb_ref[...].astype(jnp.float32)).astype(o_ref.dtype)


def dense_add_ln(x, w, b, residual, gamma, beta, eps=1e-12):
    M, K = x.shape
    N = w.shape[1]
    tm, Mp = _pick_tile_and_pad(M, _dense_max_tile(K, N))
    x_p = _pad_rows(x, Mp)
    r_p = _pad_rows(residual, Mp)
    out = pl.pallas_call(
        functools.partial(_dense_add_ln_kernel, eps=eps),
        out_shape=jax.ShapeDtypeStruct((Mp, N), x.dtype),
        grid=(Mp // tm,),
        in_specs=[
            pl.BlockSpec((tm, K), lambda i: (i, 0)),
            _const_spec((K, N), lambda i: (0, 0)),
            _const_spec((1, N), lambda i: (0, 0)),
            pl.BlockSpec((tm, N), lambda i: (i, 0)),
            _const_spec((1, N), lambda i: (0, 0)),
            _const_spec((1, N), lambda i: (0, 0)),
        ],
        out_specs=pl.BlockSpec((tm, N), lambda i: (i, 0)),
        compiler_params=pltpu.CompilerParams(
            dimension_semantics=("parallel",),
            vmem_limit_bytes=VMEM_LIMIT_BYTES),
    )(x_p, w, b.reshape(1, N), r_p, gamma.reshape(1, N), beta.reshape(1, N))
    return out if Mp == M else out[:M]


def _ln_kernel(x_ref, g_ref, b_ref, o_ref, *, eps):
    h = x_ref[...].astype(jnp.float32)
    mu = jnp.mean(h, axis=-1, keepdims=True)
    var = jnp.mean(jnp.square(h - mu), axis=-1, keepdims=True)
    o_ref[...] = ((h - mu) * lax.rsqrt(var + eps)
                  * g_ref[...].astype(jnp.float32)
                  + b_ref[...].astype(jnp.float32)).astype(o_ref.dtype)


def layernorm(x, gamma, beta, eps=1e-12):
    M, H = x.shape
    # Memory-bound: use bigger tiles (amortize ~0.35 us per grid step).
    tm, Mp = _pick_tile_and_pad(M, 1024)
    x_p = _pad_rows(x, Mp)
    out = pl.pallas_call(
        functools.partial(_ln_kernel, eps=eps),
        out_shape=jax.ShapeDtypeStruct((Mp, H), x.dtype),
        grid=(Mp // tm,),
        in_specs=[
            pl.BlockSpec((tm, H), lambda i: (i, 0)),
            _const_spec((1, H), lambda i: (0, 0)),
            _const_spec((1, H), lambda i: (0, 0)),
        ],
        out_specs=pl.BlockSpec((tm, H), lambda i: (i, 0)),
        compiler_params=pltpu.CompilerParams(
            dimension_semantics=("parallel",),
            vmem_limit_bytes=VMEM_LIMIT_BYTES),
    )(x_p, gamma.reshape(1, H), beta.reshape(1, H))
    return out if Mp == M else out[:M]


# --- attention ---------------------------------------------------------------
def _attn_group_kernel(q_ref, k_ref, v_ref, m_ref, o_ref, *, hg, dh, scale):
    # One (batch, head-group) stripe per grid step; GW = hg*dh = 128 lanes.
    S = q_ref.shape[1]
    # Fold 1/sqrt(dh) into q (S*GW mults instead of S*S per head).
    q_all = (q_ref[0].astype(jnp.float32) * scale).astype(q_ref.dtype)
    k_all = k_ref[0]
    v_all = v_ref[0]
    mb = jnp.broadcast_to(m_ref[0].astype(jnp.float32), (S, S))  # hoisted
    ctxs = []
    for h in range(hg):                         # hg is small (typically 2)
        lo, hi = h * dh, (h + 1) * dh
        s = lax.dot_general(q_all[:, lo:hi], k_all[:, lo:hi],
                            (((1,), (1,)), ((), ())),
                            preferred_element_type=jnp.float32)
        s = s + mb
        s = s - jnp.max(s, axis=-1, keepdims=True)
        p = jnp.exp(s)
        p = p * pl.reciprocal(jnp.sum(p, axis=-1, keepdims=True), approx=True)
        ctxs.append(jnp.dot(p.astype(v_all.dtype), v_all[:, lo:hi],
                            preferred_element_type=jnp.float32))
    ctx = jnp.concatenate(ctxs, axis=-1) if hg > 1 else ctxs[0]
    o_ref[0] = ctx.astype(o_ref.dtype)          # one 128-lane-dense store


def _attn_full_kernel(qkv_ref, m_ref, o_ref, *, nh, dh, scale):
    # Fallback: one batch element per grid step, full (S, 3H) slab (H < 128).
    S = qkv_ref.shape[1]
    H = nh * dh
    qkv = qkv_ref[0]
    mb = jnp.broadcast_to(m_ref[0].astype(jnp.float32), (S, S))  # hoisted
    ctxs = []
    for h in range(nh):
        q = (qkv[:, h * dh:(h + 1) * dh].astype(jnp.float32)
             * scale).astype(qkv.dtype)
        k = qkv[:, H + h * dh:H + (h + 1) * dh]
        v = qkv[:, 2 * H + h * dh:2 * H + (h + 1) * dh]
        s = lax.dot_general(q, k, (((1,), (1,)), ((), ())),
                            preferred_element_type=jnp.float32)
        s = s + mb
        s = s - jnp.max(s, axis=-1, keepdims=True)
        p = jnp.exp(s)
        p = p * pl.reciprocal(jnp.sum(p, axis=-1, keepdims=True), approx=True)
        ctxs.append(jnp.dot(p.astype(v.dtype), v,
                            preferred_element_type=jnp.float32))
    # Single full-width store instead of nh narrow masked stores.
    o_ref[0] = jnp.concatenate(ctxs, axis=-1).astype(o_ref.dtype)


def attention(qkv, addmask, nh):
    # qkv: (B, S, 3H) bf16 (fused Q|K|V), addmask: (B, 1, S) f32 additive.
    B, S, H3 = qkv.shape
    H = H3 // 3
    dh = H // nh
    scale = 1.0 / math.sqrt(dh)

    if H % 128 == 0 and 128 % dh == 0:
        # 2-D grid over (batch, 128-wide head-group); BlockSpec slices the
        # Q / K / V sections of the fused slab directly.
        GW = 128
        G = H // GW
        hg = GW // dh
        return pl.pallas_call(
            functools.partial(_attn_group_kernel, hg=hg, dh=dh, scale=scale),
            out_shape=jax.ShapeDtypeStruct((B, S, H), qkv.dtype),
            grid=(B, G),
            in_specs=[
                pl.BlockSpec((1, S, GW), lambda b, g: (b, 0, g)),
                pl.BlockSpec((1, S, GW), lambda b, g: (b, 0, G + g)),
                pl.BlockSpec((1, S, GW), lambda b, g: (b, 0, 2 * G + g)),
                pl.BlockSpec((1, 1, S), lambda b, g: (b, 0, 0)),
            ],
            out_specs=pl.BlockSpec((1, S, GW), lambda b, g: (b, 0, g)),
            compiler_params=pltpu.CompilerParams(
                dimension_semantics=("parallel", "parallel"),
                vmem_limit_bytes=VMEM_LIMIT_BYTES),
        )(qkv, qkv, qkv, addmask)

    # Fallback for small H (test config): per-batch full-slab kernel.
    return pl.pallas_call(
        functools.partial(_attn_full_kernel, nh=nh, dh=dh, scale=scale),
        out_shape=jax.ShapeDtypeStruct((B, S, H), qkv.dtype),
        grid=(B,),
        in_specs=[
            pl.BlockSpec((1, S, H3), lambda b: (b, 0, 0)),
            pl.BlockSpec((1, 1, S), lambda b: (b, 0, 0)),
        ],
        out_specs=pl.BlockSpec((1, S, H), lambda b: (b, 0, 0)),
        compiler_params=pltpu.CompilerParams(
            dimension_semantics=("parallel",),
            vmem_limit_bytes=VMEM_LIMIT_BYTES),
    )(qkv, addmask)


# ----------------------------------------------------------------------------
# Parameter init (synthetic, deterministic) — transformer weights in bf16,
# classifier heads in f32 (matches reference head dtype).
# ----------------------------------------------------------------------------
def init_params(key, cfg):
    H, I = cfg["hidden"], cfg["intermediate"]
    dt = jnp.bfloat16

    def nrm(k, shape, dtype=dt):
        return (0.02 * jax.random.normal(k, shape)).astype(dtype)

    keys = iter(jax.random.split(key, 8 + cfg["layers"] * 8 + 2))
    params = {
        "word_emb": nrm(next(keys), (cfg["vocab"], H)),
        "pos_emb": nrm(next(keys), (cfg["max_pos"], H)),
        "type_emb": nrm(next(keys), (cfg["type_vocab"], H)),
        "emb_ln_g": jnp.ones((H,), dt),
        "emb_ln_b": jnp.zeros((H,), dt),
        "layers": [],
    }
    for _ in range(cfg["layers"]):
        params["layers"].append({
            # fused Q|K|V projection
            "wqkv": nrm(next(keys), (H, 3 * H)),
            "bqkv": jnp.zeros((3 * H,), dt),
            "wo": nrm(next(keys), (H, H)), "bo": jnp.zeros((H,), dt),
            "ln1_g": jnp.ones((H,), dt), "ln1_b": jnp.zeros((H,), dt),
            "wi": nrm(next(keys), (H, I)), "bi": jnp.zeros((I,), dt),
            "wf": nrm(next(keys), (I, H)), "bf": jnp.zeros((H,), dt),
            "ln2_g": jnp.ones((H,), dt), "ln2_b": jnp.zeros((H,), dt),
        })

    # 14 linear heads (13 x 4 + 1 x 2 = 54 outputs), fused into one (H, 54)
    # f32 matmul applied by XLA (tiny; per perf review).
    params["heads_w"] = nrm(next(keys), (H, 54), jnp.float32)
    params["heads_b"] = jnp.zeros((54,), jnp.float32)
    return params


# ----------------------------------------------------------------------------
# Forward pass (mirrors bert_labeler.forward, eval mode)
# ----------------------------------------------------------------------------
def bert_labeler_forward(params, source_padded, attention_mask, cfg):
    B, S = source_padded.shape
    H, nh = cfg["hidden"], cfg["heads"]

    # --- BERT embeddings (gather is glue; LN-only Pallas kernel) ------------
    # TODO(synk): token_type_ids assumed all-zero (single-segment CheXbert use).
    emb = (params["word_emb"][source_padded]
           + params["pos_emb"][None, :S, :]
           + params["type_emb"][0][None, None, :])
    x = emb.reshape(B * S, H).astype(jnp.bfloat16)
    h = layernorm(x, params["emb_ln_g"], params["emb_ln_b"])

    # Additive attention mask, HF-BERT style: (B, 1, S)
    addmask = ((1.0 - attention_mask.astype(jnp.float32)) * -10000.0)[:, None, :]

    # --- Transformer encoder layers -----------------------------------------
    for layer in params["layers"]:
        qkv = dense(h, layer["wqkv"], layer["bqkv"])             # (B*S, 3H)
        ctx = attention(qkv.reshape(B, S, 3 * H), addmask, nh)   # (B, S, H)
        h = dense_add_ln(ctx.reshape(B * S, H), layer["wo"], layer["bo"], h,
                         layer["ln1_g"], layer["ln1_b"])
        inter = dense(h, layer["wi"], layer["bi"], activation="gelu")
        h = dense_add_ln(inter, layer["wf"], layer["bf"], h,
                         layer["ln2_g"], layer["ln2_b"])

    final_hidden = h.reshape(B, S, H)                 # == self.bert(...)[0]
    cls_hidden0 = final_hidden[:, 0, :].astype(jnp.float32)
    cls_hidden = cls_hidden0                          # dropout(p=0.1) identity in eval

    # --- 14 linear heads: tiny f32 matmul, left to XLA (per perf review) ----
    logits = cls_hidden @ params["heads_w"] + params["heads_b"]   # (B, 54)
    out = [logits[:, 4 * i:4 * (i + 1)] for i in range(13)]
    out.append(logits[:, 52:54])
    return out, cls_hidden0


# ----------------------------------------------------------------------------
if __name__ == "__main__":
    B, S = 2, 8
    # Config 1: tiny model (exercises the full-slab attention fallback, H<128).
    cfg1 = dict(vocab=64, max_pos=16, type_vocab=2,
                hidden=32, heads=4, intermediate=64, layers=2)
    # Config 2: H=128 exercises the (batch, head-group) regridded attention
    # with 128-lane-dense output stores.
    cfg2 = dict(vocab=64, max_pos=16, type_vocab=2,
                hidden=128, heads=2, intermediate=256, layers=1)

    root = jax.random.PRNGKey(0)
    k_param1, k_param2, k_ids = jax.random.split(root, 3)
    source_padded = jax.random.randint(k_ids, (B, S), 0, 64, dtype=jnp.int32)
    attention_mask = jnp.array([[1, 1, 1, 1, 1, 1, 0, 0],
                                [1, 1, 1, 1, 1, 1, 1, 1]], dtype=jnp.float32)

    for cfg, kp in ((cfg1, k_param1), (cfg2, k_param2)):
        params = init_params(kp, cfg)
        out, cls_hidden0 = bert_labeler_forward(params, source_padded,
                                                attention_mask, cfg)
        jax.block_until_ready(out)
        jax.block_until_ready(cls_hidden0)

        assert len(out) == 14
        assert all(o.shape == (B, 4) for o in out[:13])
        assert out[13].shape == (B, 2)
        assert cls_hidden0.shape == (B, cfg["hidden"])
        assert all(bool(jnp.all(jnp.isfinite(o))) for o in out)
        assert bool(jnp.all(jnp.isfinite(cls_hidden0)))

    print("KERNEL_OK")
</pallas_src>

<mosaic_0001>
module attributes {stable_mosaic.version = 11 : i64} {
  func.func @_copy_probe_kernel(%arg0: i32, %arg1: memref<8x128xf32, #tpu.memory_space<vmem>>, %arg2: memref<8x128xf32, #tpu.memory_space<vmem>>) attributes {dimension_semantics = [#tpu.dimension_semantics<arbitrary>], iteration_bounds = array<i64: 1>, scalar_prefetch = 0 : i64, scratch_operands = 0 : i64, tpu.core_type = #tpu.core_type<tc>, window_params = [{pipeline_mode = #tpu.pipeline_mode<synchronous>, transform_indices = @transform_0, window_bounds = array<i64: 8, 128>}, {pipeline_mode = #tpu.pipeline_mode<synchronous>, transform_indices = @transform_1, window_bounds = array<i64: 8, 128>}]} {
    %c0 = arith.constant 0 : index
    %c0_0 = arith.constant 0 : index
    %0 = vector.load %arg1[%c0, %c0_0] : memref<8x128xf32, #tpu.memory_space<vmem>>, vector<8x128xf32>
    %c0_1 = arith.constant 0 : index
    %c0_2 = arith.constant 0 : index
    %1 = vector.load %arg2[%c0_1, %c0_2] : memref<8x128xf32, #tpu.memory_space<vmem>>, vector<8x128xf32>
    tpu.vector_store %arg2[%c0_1, %c0_2], %0 {strides = array<i32>} : memref<8x128xf32, #tpu.memory_space<vmem>>, vector<8x128xf32>,
    return
  }
  func.func @transform_0(%arg0: i32) -> (i32, i32) {
    %c0_i32 = arith.constant 0 : i32
    %c0_i32_0 = arith.constant 0 : i32
    %c0_i32_1 = arith.constant 0 : i32
    return %c0_i32, %c0_i32_0 : i32, i32
  }
  func.func @transform_1(%arg0: i32) -> (i32, i32) {
    %c0_i32 = arith.constant 0 : i32
    %c0_i32_0 = arith.constant 0 : i32
    %c0_i32_1 = arith.constant 0 : i32
    return %c0_i32, %c0_i32_0 : i32, i32
  }
}

module attributes {stable_mosaic.version = 11 : i64} {
  func.func @_ln_kernel(%arg0: i32, %arg1: memref<16x32xbf16, #tpu.memory_space<vmem>>, %arg2: memref<1x32xbf16, #tpu.memory_space<vmem>>, %arg3: memref<1x32xbf16, #tpu.memory_space<vmem>>, %arg4: memref<16x32xbf16, #tpu.memory_space<vmem>>) attributes {dimension_semantics = [#tpu.dimension_semantics<parallel>], iteration_bounds = array<i64: 1>, scalar_prefetch = 0 : i64, scratch_operands = 0 : i64, tpu.core_type = #tpu.core_type<tc>, window_params = [{transform_indices = @transform_0, window_bounds = array<i64: 16, 32>}, {pipeline_mode = #tpu.pipeline_mode<synchronous>, transform_indices = @transform_1, window_bounds = array<i64: 1, 32>}, {pipeline_mode = #tpu.pipeline_mode<synchronous>, transform_indices = @transform_2, window_bounds = array<i64: 1, 32>}, {transform_indices = @transform_3, window_bounds = array<i64: 16, 32>}]} {
    %c0 = arith.constant 0 : index
    %c0_0 = arith.constant 0 : index
    %0 = vector.load %arg1[%c0, %c0_0] : memref<16x32xbf16, #tpu.memory_space<vmem>>, vector<16x32xbf16>
    %1 = arith.extf %0 : vector<16x32xbf16> to vector<16x32xf32>
    %cst = arith.constant dense<0.000000e+00> : vector<16xf32>
    %2 = vector.multi_reduction <add>, %1, %cst [1] : vector<16x32xf32> to vector<16xf32>
    %3 = vector.shape_cast %2 : vector<16xf32> to vector<16x1xf32>
    %cst_1 = arith.constant 3.200000e+01 : f32
    %4 = vector.broadcast %cst_1 : f32 to vector<16x1xf32>
    %5 = arith.divf %3, %4 : vector<16x1xf32>
    %6 = vector.broadcast %5 : vector<16x1xf32> to vector<16x32xf32>
    %7 = arith.subf %1, %6 : vector<16x32xf32>
    %8 = arith.mulf %7, %7 : vector<16x32xf32>
    %cst_2 = arith.constant dense<0.000000e+00> : vector<16xf32>
    %9 = vector.multi_reduction <add>, %8, %cst_2 [1] : vector<16x32xf32> to vector<16xf32>
    %10 = vector.shape_cast %9 : vector<16xf32> to vector<16x1xf32>
    %cst_3 = arith.constant 3.200000e+01 : f32
    %11 = vector.broadcast %cst_3 : f32 to vector<16x1xf32>
    %12 = arith.divf %10, %11 : vector<16x1xf32>
    %13 = vector.broadcast %5 : vector<16x1xf32> to vector<16x32xf32>
    %14 = arith.subf %1, %13 : vector<16x32xf32>
    %cst_4 = arith.constant 9.99999996E-13 : f32
    %15 = vector.broadcast %cst_4 : f32 to vector<16x1xf32>
    %16 = arith.addf %12, %15 : vector<16x1xf32>
    %17 = math.rsqrt %16 : vector<16x1xf32>
    %18 = vector.broadcast %17 : vector<16x1xf32> to vector<16x32xf32>
    %19 = arith.mulf %14, %18 : vector<16x32xf32>
    %c0_5 = arith.constant 0 : index
    %c0_6 = arith.constant 0 : index
    %20 = vector.load %arg2[%c0_5, %c0_6] : memref<1x32xbf16, #tpu.memory_space<vmem>>, vector<1x32xbf16>
    %21 = arith.extf %20 : vector<1x32xbf16> to vector<1x32xf32>
    %22 = vector.broadcast %21 : vector<1x32xf32> to vector<16x32xf32>
    %23 = arith.mulf %19, %22 : vector<16x32xf32>
    %c0_7 = arith.constant 0 : index
    %c0_8 = arith.constant 0 : index
    %24 = vector.load %arg3[%c0_7, %c0_8] : memref<1x32xbf16, #tpu.memory_space<vmem>>, vector<1x32xbf16>
    %25 = arith.extf %24 : vector<1x32xbf16> to vector<1x32xf32>
    %26 = vector.broadcast %25 : vector<1x32xf32> to vector<16x32xf32>
    %27 = arith.addf %23, %26 : vector<16x32xf32>
    %28 = arith.truncf %27 : vector<16x32xf32> to vector<16x32xbf16>
    %c0_9 = arith.constant 0 : index
    %c0_10 = arith.constant 0 : index
    %29 = vector.load %arg4[%c0_9, %c0_10] : memref<16x32xbf16, #tpu.memory_space<vmem>>, vector<16x32xbf16>
    tpu.vector_store %arg4[%c0_9, %c0_10], %28 {strides = array<i32>} : memref<16x32xbf16, #tpu.memory_space<vmem>>, vector<16x32xbf16>,
    return
  }
  func.func @transform_0(%arg0: i32) -> (i32, i32) {
    %c0_i32 = arith.constant 0 : i32
    %c0_i32_0 = arith.constant 0 : i32
    return %arg0, %c0_i32 : i32, i32
  }
  func.func @transform_1(%arg0: i32) -> (i32, i32) {
    %c0_i32 = arith.constant 0 : i32
    %c0_i32_0 = arith.constant 0 : i32
    %c0_i32_1 = arith.constant 0 : i32
    return %c0_i32, %c0_i32_0 : i32, i32
  }
  func.func @transform_2(%arg0: i32) -> (i32, i32) {
    %c0_i32 = arith.constant 0 : i32
    %c0_i32_0 = arith.constant 0 : i32
    %c0_i32_1 = arith.constant 0 : i32
    return %c0_i32, %c0_i32_0 : i32, i32
  }
  func.func @transform_3(%arg0: i32) -> (i32, i32) {
    %c0_i32 = arith.constant 0 : i32
    %c0_i32_0 = arith.constant 0 : i32
    return %arg0, %c0_i32 : i32, i32
  }
}

</mosaic_0001>

<bundles_post_ra>
// kernel: tpu_custom_call.1
= control target key start
LH: loop header
LB: loop body
LE: loop exit
PB: predicated region body
PF: predicated region fallthrough
CT: control target
= control target key end

     0   :  { %6 = vsyncpa [#allocation3], 0  ;;  %s114_s0 = inlined_call_operand.hbm [shape: f32[8,128], index: 0, kind: input, shape index: {}]   ;;  %s115_s1 = inlined_call_operand.hbm [shape: f32[8,128], index: 1, kind: output, shape index: {}]  }
   0x1   :  { %7 = vsyncpa [#allocation4], 0  ;;  %s13_s8 = sshll.u32 %s114_s0, 4  ;;  %s96_s9 = smov [#allocation2]   ;;  %s14_s8 = int_to_ptr.hbm [resolvable:$true] %s13_s8 }
   0x2   :  { %s15_s10 = sshll.u32 %s96_s9, 4  ;;  %s16_s10 = int_to_ptr.vmem [resolvable:$true] %s15_s10 }
   0x3   :  { %18 = dma.hbm_to_vmem [thread:$0]  %s14_s8, 128, %s16_s10, [#allocation3]  }
   0x4   :  { %92 = dma.done.wait [#allocation3], 128  }
   0x5   :  { %93 = vsyncadd [#allocation3], 4294967168  ;;  %s97_s11 = smov [#allocation5]   ;;  %s32_s15 = sshll.u32 %s115_s1, 4  ;;  %v23_v0 = vld [vmem:[#allocation2] sm:$0xff]  ;;  %s33_s15 = int_to_ptr.hbm [resolvable:$true] %s32_s15 }
   0x6   :  { %s30_s12 = sshll.u32 %s97_s11, 4  ;;  %24 = vst [vmem:[#allocation5] sm:$0xff] %v23_v0  ;;  %s31_s12 = int_to_ptr.vmem [resolvable:$true] %s30_s12 }
   0x7   :  { %35 = dma.vmem_to_hbm [thread:$0]  %s31_s12, 128, %s33_s15, [#allocation4]  }
   0x8   :  { %94 = dma.done.wait [#allocation4], 128  }
   0x9   :  { %95 = vsyncadd [#allocation4], 4294967168 }
   0xa   :  { %40 = vsyncpa [#allocation3], 1 }
   0xb   :  { %41 = vsyncpa [#allocation4], 1 }

// kernel: tpu_custom_call.1
= control target key start
LH: loop header
LB: loop body
LE: loop exit
PB: predicated region body
PF: predicated region fallthrough
CT: control target
= control target key end

     0   :  { %8 = vsyncpa [#allocation3], 0  ;;  %s278_s0 = inlined_call_operand.hbm [shape: bf16[16,32], index: 0, kind: input, shape index: {}]   ;;  %s279_s1 = inlined_call_operand.hbm [shape: bf16[1,32], index: 1, kind: input, shape index: {}]   ;;  %s280_s2 = inlined_call_operand.vmem [shape: bf16[1,32], index: 2, kind: input, shape index: {}]   ;;  %s281_s3 = inlined_call_operand.hbm [shape: bf16[16,32], index: 3, kind: output, shape index: {}]  }
   0x1   :  { %9 = vsyncpa [#allocation6], 0 }
   0x2   :  { %10 = vsyncpa [#allocation4], 0  ;;  %s15_s14 = sshll.u32 %s278_s0, 4  ;;  %s230_s15 = smov [#allocation2]   ;;  %s16_s14 = int_to_ptr.hbm [resolvable:$true] %s15_s14 }
   0x3   :  { %s17_s16 = sshll.u32 %s230_s15, 4  ;;  %s29_s19 = sshll.u32 %s279_s1, 4  ;;  %s18_s16 = int_to_ptr.vmem [resolvable:$true] %s17_s16  ;;  %s30_s19 = int_to_ptr.hbm [resolvable:$true] %s29_s19 }
   0x4   :  { %s231_s20 = smov 64   ;;  %s232_s21 = smov 4  }
   0x5   :  { %23 = dma.hbm_to_vmem [thread:$0]  %s16_s14, 128, %s18_s16, [#allocation3], %s231_s20, %s231_s20, %s232_s21  }
   0x6   :  { %s233_s22 = smov [#allocation5]  }
   0x7   :  { %s31_s23 = sshll.u32 %s233_s22, 4  ;;  %s32_s23 = int_to_ptr.vmem [resolvable:$true] %s31_s23 }
   0x8   :  { %34 = dma.hbm_to_vmem [thread:$0]  %s30_s19, 16, %s32_s23, [#allocation6]  }
   0x9   :  { %224 = dma.done.wait [#allocation3], 128  }
   0xa   :  { %225 = vsyncadd [#allocation3], 4294967168 }
   0xb   :  { %226 = dma.done.wait [#allocation6], 16  }
   0xc   :  { %227 = vsyncadd [#allocation6], 4294967280  ;;  %v137_v0 = vld [vmem:[#allocation2] sm:$0xff]   ;;  %vm49_vm0 = vcmask 261120   ;;  %v234_v5 = vmov 32.0   ;;  %vm113_vm7 = vcmask 257024  }
   0xd   :  { %v138_v1 = vunpack.c.l.bf16 %v137_v0  ;;  %v139_v3 = vunpack.c.h.bf16 %v137_v0  ;;  %146 = vrcp.f32 %v234_v5  ;;  %v101_v30 = vld [vmem:[#allocation5] sm:$0x1]  ;;  %v106_v33 = vld [vmem:[%s280_s2] sm:$0x1]  ;;  %s235_s2 = smov [#allocation7]   ;;  %s122_s27 = sshll.u32 %s281_s3, 4  ;;  %s123_s27 = int_to_ptr.hbm [resolvable:$true] %s122_s27 }
   0xe   :  { %v102_v34 = vunpack.c.l.bf16 %v101_v30  ;;  %v107_v37 = vunpack.c.l.bf16 %v106_v33  ;;  %s120_s24 = sshll.u32 %s235_s2, 4  ;;  %s121_s24 = int_to_ptr.vmem [resolvable:$true] %s120_s24 }
   0xf   :  { %v50_v2 = vsel %vm49_vm0, %v138_v1, 0.0  ;;  %v53_v4 = vsel %vm49_vm0, %v139_v3, 0.0 }
  0x10   :  { %51 = vadd.xlane.f32.xlu0 %v50_v2  ;;  %v103_v40 = vperm.slane %v102_v34, 0  ;;  %v108_v44 = vperm.slane %v107_v37, 0 }
  0x13   :  { %v147_v6 = vpop.eup %146 }
  0x14   :  { %v57_v7 = vmul.f32 32.0, %v147_v6  ;;  %vm61_vm1 = vweird.f32 %v147_v6 }
  0x16   :  { %v58_v8 = vsub.f32 1.0, %v57_v7 }
  0x18   :  { %54 = vadd.xlane.f32.xlu0 %v53_v4  ;;  %v59_v9 = vmul.f32 %v147_v6, %v58_v8 }
  0x1a   :  { %v60_v10 = vadd.f32 %v147_v6, %v59_v9 }
  0x1c   :  { %v62_v11 = vsel %vm61_vm1, %v147_v6, %v60_v10 }
  0x83   :  { %v52_v12 = vpop.xlane.xlu0 %51 }
  0x84   :  { %v63_v13 = vmul.f32 %v62_v11, %v52_v12 }
  0x86   :  { %v65_v14 = vsub.f32 %v138_v1, %v63_v13 }
  0x88   :  { %v67_v15 = vmul.f32 %v65_v14, %v65_v14 }
  0x8a   :  { %v69_v16 = vsel %vm49_vm0, %v67_v15, 0.0 }
  0x8b   :  { %70 = vadd.xlane.f32.xlu1 %v69_v16  ;;  %v55_v17 = vpop.xlane.xlu0 %54 }
  0x8c   :  { %v64_v18 = vmul.f32 %v62_v11, %v55_v17 }
  0x8e   :  { %v66_v19 = vsub.f32 %v139_v3, %v64_v18 }
  0x90   :  { %v68_v20 = vmul.f32 %v66_v19, %v66_v19 }
  0x92   :  { %v72_v21 = vsel %vm49_vm0, %v68_v20, 0.0 }
  0x93   :  { %73 = vadd.xlane.f32.xlu1 %v72_v21 }
  0xfe   :  { %v71_v22 = vpop.xlane.xlu1 %70 }
  0xff   :  { %v75_v23 = vmul.f32 %v71_v22, %v62_v11 }
 0x101   :  { %v77_v24 = vadd.f32 1e-12, %v75_v23 }
 0x103   :  { %148 = vrsqrt.f32 %v77_v24  ;;  %vm85_vm3 = vweird.f32 %v77_v24 }
 0x106   :  { %v74_v25 = vpop.xlane.xlu1 %73 }
 0x107   :  { %v76_v26 = vmul.f32 %v74_v25, %v62_v11 }
 0x109   :  { %v149_v27 = vpop.eup %148  ;;  %v78_v28 = vadd.f32 1e-12, %v76_v26 }
 0x10a   :  { %v80_v29 = vmul.f32 %v149_v27, %v77_v24  ;;  %vm86_vm2 = vweird.f32 %v149_v27 }
 0x10b   :  { %150 = vrsqrt.f32 %v78_v28  ;;  %vm87_vm4 = vmor %vm85_vm3, %vm86_vm2  ;;  %vm95_vm6 = vweird.f32 %v78_v28 }
 0x10c   :  { %v81_v31 = vmul.f32 %v149_v27, %v80_v29 }
 0x10e   :  { %v82_v32 = vmul.f32 0.5, %v81_v31 }
 0x110   :  { %v83_v35 = vsub.f32 1.5, %v82_v32 }
 0x111   :  { %v151_v36 = vpop.eup %150 }
 0x112   :  { %v84_v38 = vmul.f32 %v149_v27, %v83_v35  ;;  %v90_v39 = vmul.f32 %v151_v36, %v78_v28  ;;  %vm96_vm5 = vweird.f32 %v151_v36 }
 0x113   :  { %vm97_vm8 = vmor %vm95_vm6, %vm96_vm5 }
 0x114   :  { %v88_v41 = vsel %vm87_vm4, %v149_v27, %v84_v38  ;;  %v91_v42 = vmul.f32 %v151_v36, %v90_v39 }
 0x115   :  { %v99_v43 = vmul.f32 %v88_v41, %v65_v14 }
 0x116   :  { %v92_v45 = vmul.f32 0.5, %v91_v42 }
 0x117   :  { %v104_v46 = vmul.f32 %v103_v40, %v99_v43 }
 0x118   :  { %v93_v47 = vsub.f32 1.5, %v92_v45 }
 0x119   :  { %v109_v48 = vadd.f32 %v108_v44, %v104_v46 }
 0x11a   :  { %v94_v49 = vmul.f32 %v151_v36, %v93_v47 }
 0x11b   :  { %v111_v50 = vpack.c.bf16 %v109_v48, %v109_v48 }
 0x11c   :  { %v98_v51 = vsel %vm97_vm8, %v151_v36, %v94_v49 }
 0x11d   :  { %v100_v52 = vmul.f32 %v98_v51, %v66_v19  ;;  %114 = vst.msk [vmem:[#allocation7] sm:$0xf] %vm113_vm7, %v111_v50 }
 0x11f   :  { %v105_v53 = vmul.f32 %v103_v40, %v100_v52 }
 0x121   :  { %v110_v54 = vadd.f32 %v108_v44, %v105_v53 }
 0x123   :  { %v112_v55 = vpack.c.bf16 %v110_v54, %v110_v54 }
 0x125   :  { %115 = vst.msk [vmem:[#allocation7 + $0x4] sm:$0xf] %vm113_vm7, %v112_v55 }
 0x126   :  { %128 = dma.vmem_to_hbm [thread:$0]  %s121_s24, 128, %s123_s27, [#allocation4], %s231_s20, %s231_s20, %s232_s21  }
 0x127   :  { %228 = dma.done.wait [#allocation4], 128  }
 0x128   :  { %229 = vsyncadd [#allocation4], 4294967168 }
 0x129   :  { %133 = vsyncpa [#allocation3], 1 }
 0x12a   :  { %134 = vsyncpa [#allocation6], 1 }
 0x12b   :  { %135 = vsyncpa [#allocation4], 1 }

</bundles_post_ra>
